<compile_context>
chip_gen: v7x
topology: tpu7x:2x2x1
jax: 0.10.0
libtpu: 0.0.40
codegen_flags: <defaults>
</compile_context>

<pallas_src>
import functools

import jax
import jax.numpy as jnp
from jax.experimental import pallas as pl
from jax.experimental.pallas import tpu as pltpu


def ndwt_kernel(off_ref, x_ref, ml_ref, mh_ref, o_ref, *, w):
    # x_ref block: (1, Rb, 2W).  Lane [0:W] = even image row, [W:2W] = odd row.
    # ml_ref/mh_ref: (W, W2) constant column low/high-pass weights (pre-scaled
    # by 0.5/b).  o_ref block: (1, 4, Rb, W2) -> subbands LL, HL, LH, HH.
    v = x_ref[0]                       # (Rb, 2W)
    ve = v[:, :w]                      # even image rows
    vo = v[:, w:]                      # odd image rows

    rs = ve + vo                       # row low-pass  (un-normalized)
    rd = vo - ve                       # row high-pass (un-normalized)

    ml = ml_ref[...]
    mh = mh_ref[...]
    hi = jax.lax.Precision.HIGHEST     # keep f32 accuracy on the MXU
    f32 = jnp.float32

    # TODO(synk): Mosaic has no robust lane-stride-2 slice primitive, so the
    # even/odd column deinterleave + column butterfly are routed through the
    # (idle) MXU as two tiny constant matmuls instead of strided lane loads.
    ll = jnp.dot(rs, ml, precision=hi, preferred_element_type=f32) + off_ref[0]
    hl = jnp.dot(rs, mh, precision=hi, preferred_element_type=f32)
    lh = jnp.dot(rd, ml, precision=hi, preferred_element_type=f32)
    hh = jnp.dot(rd, mh, precision=hi, preferred_element_type=f32)

    dt = o_ref.dtype
    o_ref[0, 0, :, :] = ll.astype(dt)
    o_ref[0, 1, :, :] = hl.astype(dt)
    o_ref[0, 2, :, :] = lh.astype(dt)
    o_ref[0, 3, :, :] = hh.astype(dt)


def _pick_row_block(r2, row_bytes, n_outer, target_bytes=4 << 20, min_steps=4):
    """Row-block size Rb: multiple-of-8 divisor of r2, ~target_bytes per block,
    while keeping >= min_steps total grid steps (pipelining / v7x 2 TCs).
    Falls back to the full extent (always a legal block) if no divisor exists."""
    divisors = [d for d in range(8, r2 + 1, 8) if r2 % d == 0]
    if not divisors:
        # TODO(synk): odd/tiny C*H2 — whole-slab block; fine for small inputs.
        return r2
    budget = max(8, target_bytes // max(row_bytes, 1))
    fitting = [d for d in divisors if d <= budget]
    rb = max(fitting) if fitting else min(divisors)
    while n_outer * (r2 // rb) < min_steps:
        smaller = [d for d in divisors if d < rb]
        if not smaller:
            break
        rb = max(smaller)
    return rb


def ndwt(x, a, b):
    """Equivalent of NDWT(a, b).forward(x) for NCHW input x."""
    N, C, H, W = x.shape
    assert H % 2 == 0 and W % 2 == 0, "NDWT needs even spatial dims"
    H2, W2 = H // 2, W // 2
    R2 = C * H2
    itemsize = jnp.dtype(x.dtype).itemsize

    # Free, contiguous view: each row is an (even, odd) image-row pair.
    xv = x.reshape(N, R2, 2 * W)

    # Constant column-transform weights: deinterleave + butterfly + scale.
    scale = 0.5 / b                                   # ((x - a)/b) / 2
    col = jnp.arange(W, dtype=jnp.int32)[:, None]     # (W, 1)
    j2 = 2 * jnp.arange(W2, dtype=jnp.int32)[None, :]  # (1, W2)
    even_hit = (col == j2).astype(x.dtype)
    odd_hit = (col == j2 + 1).astype(x.dtype)
    ml = ((even_hit + odd_hit) * scale).astype(x.dtype)   # col low-pass
    mh = ((odd_hit - even_hit) * scale).astype(x.dtype)   # col high-pass
    # Additive offset cancels in HL/LH/HH; LL gets 4 * (-a*scale) = -2a/b.
    off = jnp.full((1,), -2.0 * a / b, dtype=jnp.float32)

    Rb = _pick_row_block(R2, 2 * W * itemsize, N)
    grid = (N, pl.cdiv(R2, Rb))

    kernel = functools.partial(ndwt_kernel, w=W)
    out = pl.pallas_call(
        kernel,
        grid=grid,
        in_specs=[
            pl.BlockSpec(memory_space=pltpu.MemorySpace.SMEM),        # off (scalar)
            pl.BlockSpec((1, Rb, 2 * W), lambda n, r: (n, r, 0)),     # x view
            pl.BlockSpec((W, W2), lambda n, r: (0, 0)),               # ml (const)
            pl.BlockSpec((W, W2), lambda n, r: (0, 0)),               # mh (const)
        ],
        out_specs=pl.BlockSpec((1, 4, Rb, W2), lambda n, r: (n, 0, r, 0)),
        out_shape=jax.ShapeDtypeStruct((N, 4, R2, W2), x.dtype),
        compiler_params=pltpu.CompilerParams(
            dimension_semantics=("parallel", "parallel"),
            vmem_limit_bytes=48 * 1024 * 1024),
        cost_estimate=pl.CostEstimate(
            flops=int(8 * N * R2 * W * W2),
            transcendentals=0,
            bytes_accessed=int(2 * N * R2 * 2 * W * itemsize
                               + 2 * W * W2 * itemsize)),
    )(off, xv, ml, mh)

    # (N, 4, C*H2, W2) -> (N, 4C, H2, W2): channel = subband*C + c, which is
    # exactly the torch.cat((LL,HL,LH,HH), dim=1) ordering.  Free reshape.
    return out.reshape(N, 4 * C, H2, W2)


def ndwt_ref(x, a, b):
    """Pure-JAX reference, mirroring the PyTorch code line-by-line."""
    xn = (x - a) / b
    x01 = xn[:, :, 0::2, :] / 2
    x02 = xn[:, :, 1::2, :] / 2
    x1 = x01[:, :, :, 0::2]
    x2 = x02[:, :, :, 0::2]
    x3 = x01[:, :, :, 1::2]
    x4 = x02[:, :, :, 1::2]
    x_LL = x1 + x2 + x3 + x4
    x_HL = -x1 - x2 + x3 + x4
    x_LH = -x1 + x2 - x3 + x4
    x_HH = x1 - x2 - x3 + x4
    return jnp.concatenate([x_LL, x_HL, x_LH, x_HH], axis=1)


if __name__ == "__main__":
    # Deterministic parameters (the module's __init__ takes a, b).
    a = 0.5
    b = 2.0

    key = jax.random.PRNGKey(0)
    x = jax.random.normal(key, (2, 4, 16, 16), dtype=jnp.float32)

    out = jax.block_until_ready(ndwt(x, a, b))
    ref = ndwt_ref(x, a, b)

    assert out.shape == (2, 16, 8, 8), out.shape
    # Affine folding + HIGHEST-precision MXU accumulation differ from the
    # literal (x-a)/b/2 formulation only by a few ulps.
    assert jnp.allclose(out, ref, atol=1e-5, rtol=1e-5), "mismatch vs reference"

    print("KERNEL_OK")
</pallas_src>

<mosaic_0001>
module attributes {stable_mosaic.version = 11 : i64} {
  func.func @ndwt_kernel(%arg0: i32, %arg1: i32, %arg2: memref<1xf32, #tpu.memory_space<smem>>, %arg3: memref<1x16x32xf32, #tpu.memory_space<vmem>>, %arg4: memref<16x8xf32, #tpu.memory_space<vmem>>, %arg5: memref<16x8xf32, #tpu.memory_space<vmem>>, %arg6: memref<1x4x16x8xf32, #tpu.memory_space<vmem>>) attributes {dimension_semantics = [#tpu.dimension_semantics<parallel>, #tpu.dimension_semantics<parallel>], iteration_bounds = array<i64: 2, 2>, scalar_prefetch = 0 : i64, scratch_operands = 0 : i64, tpu.core_type = #tpu.core_type<tc>, window_params = [{transform_indices = @transform_0, window_bounds = array<i64: 1>}, {transform_indices = @transform_1, window_bounds = array<i64: 1, 16, 32>}, {pipeline_mode = #tpu.pipeline_mode<synchronous>, transform_indices = @transform_2, window_bounds = array<i64: 16, 8>}, {pipeline_mode = #tpu.pipeline_mode<synchronous>, transform_indices = @transform_3, window_bounds = array<i64: 16, 8>}, {transform_indices = @transform_4, window_bounds = array<i64: 1, 4, 16, 8>}]} {
    %c0 = arith.constant 0 : index
    %c0_0 = arith.constant 0 : index
    %c0_1 = arith.constant 0 : index
    %0 = vector.load %arg3[%c0, %c0_0, %c0_1] : memref<1x16x32xf32, #tpu.memory_space<vmem>>, vector<1x16x32xf32>
    %1 = vector.shape_cast %0 : vector<1x16x32xf32> to vector<16x32xf32>
    %2 = vector.extract_strided_slice %1 {offsets = [0, 0], sizes = [16, 16], strides = [1, 1]} : vector<16x32xf32> to vector<16x16xf32>
    %3 = vector.extract_strided_slice %1 {offsets = [0, 16], sizes = [16, 16], strides = [1, 1]} : vector<16x32xf32> to vector<16x16xf32>
    %4 = arith.addf %2, %3 : vector<16x16xf32>
    %5 = arith.subf %3, %2 : vector<16x16xf32>
    %c0_2 = arith.constant 0 : index
    %c0_3 = arith.constant 0 : index
    %6 = vector.load %arg4[%c0_2, %c0_3] : memref<16x8xf32, #tpu.memory_space<vmem>>, vector<16x8xf32>
    %c0_4 = arith.constant 0 : index
    %c0_5 = arith.constant 0 : index
    %7 = vector.load %arg5[%c0_4, %c0_5] : memref<16x8xf32, #tpu.memory_space<vmem>>, vector<16x8xf32>
    %cst = arith.constant dense<0.000000e+00> : vector<16x8xf32>
    %8 = tpu.matmul %4, %6, %cst {dimension_numbers = #tpu.dot_dimension_numbers<[1], [0], [0], [1], [0, 0, 1, 1], [], []>, precision = #tpu.contract_precision<fp32>} : vector<16x16xf32>, vector<16x8xf32>, vector<16x8xf32> -> vector<16x8xf32>
    %c0_6 = arith.constant 0 : index
    %9 = memref.load %arg2[%c0_6] : memref<1xf32, #tpu.memory_space<smem>>
    %10 = vector.broadcast %9 : f32 to vector<16x8xf32>
    %11 = arith.addf %8, %10 : vector<16x8xf32>
    %cst_7 = arith.constant dense<0.000000e+00> : vector<16x8xf32>
    %12 = tpu.matmul %4, %7, %cst_7 {dimension_numbers = #tpu.dot_dimension_numbers<[1], [0], [0], [1], [0, 0, 1, 1], [], []>, precision = #tpu.contract_precision<fp32>} : vector<16x16xf32>, vector<16x8xf32>, vector<16x8xf32> -> vector<16x8xf32>
    %cst_8 = arith.constant dense<0.000000e+00> : vector<16x8xf32>
    %13 = tpu.matmul %5, %6, %cst_8 {dimension_numbers = #tpu.dot_dimension_numbers<[1], [0], [0], [1], [0, 0, 1, 1], [], []>, precision = #tpu.contract_precision<fp32>} : vector<16x16xf32>, vector<16x8xf32>, vector<16x8xf32> -> vector<16x8xf32>
    %cst_9 = arith.constant dense<0.000000e+00> : vector<16x8xf32>
    %14 = tpu.matmul %5, %7, %cst_9 {dimension_numbers = #tpu.dot_dimension_numbers<[1], [0], [0], [1], [0, 0, 1, 1], [], []>, precision = #tpu.contract_precision<fp32>} : vector<16x16xf32>, vector<16x8xf32>, vector<16x8xf32> -> vector<16x8xf32>
    %c0_10 = arith.constant 0 : index
    %c0_11 = arith.constant 0 : index
    %c0_12 = arith.constant 0 : index
    %c0_13 = arith.constant 0 : index
    %15 = vector.load %arg6[%c0_10, %c0_11, %c0_12, %c0_13] : memref<1x4x16x8xf32, #tpu.memory_space<vmem>>, vector<1x1x16x8xf32>
    %16 = vector.shape_cast %15 : vector<1x1x16x8xf32> to vector<16x8xf32>
    %17 = vector.shape_cast %11 : vector<16x8xf32> to vector<1x1x16x8xf32>
    tpu.vector_store %arg6[%c0_10, %c0_11, %c0_12, %c0_13], %17 {strides = array<i32>} : memref<1x4x16x8xf32, #tpu.memory_space<vmem>>, vector<1x1x16x8xf32>,
    %c0_14 = arith.constant 0 : index
    %c1 = arith.constant 1 : index
    %c0_15 = arith.constant 0 : index
    %c0_16 = arith.constant 0 : index
    %18 = vector.load %arg6[%c0_14, %c1, %c0_15, %c0_16] : memref<1x4x16x8xf32, #tpu.memory_space<vmem>>, vector<1x1x16x8xf32>
    %19 = vector.shape_cast %18 : vector<1x1x16x8xf32> to vector<16x8xf32>
    %20 = vector.shape_cast %12 : vector<16x8xf32> to vector<1x1x16x8xf32>
    tpu.vector_store %arg6[%c0_14, %c1, %c0_15, %c0_16], %20 {strides = array<i32>} : memref<1x4x16x8xf32, #tpu.memory_space<vmem>>, vector<1x1x16x8xf32>,
    %c0_17 = arith.constant 0 : index
    %c2 = arith.constant 2 : index
    %c0_18 = arith.constant 0 : index
    %c0_19 = arith.constant 0 : index
    %21 = vector.load %arg6[%c0_17, %c2, %c0_18, %c0_19] : memref<1x4x16x8xf32, #tpu.memory_space<vmem>>, vector<1x1x16x8xf32>
    %22 = vector.shape_cast %21 : vector<1x1x16x8xf32> to vector<16x8xf32>
    %23 = vector.shape_cast %13 : vector<16x8xf32> to vector<1x1x16x8xf32>
    tpu.vector_store %arg6[%c0_17, %c2, %c0_18, %c0_19], %23 {strides = array<i32>} : memref<1x4x16x8xf32, #tpu.memory_space<vmem>>, vector<1x1x16x8xf32>,
    %c0_20 = arith.constant 0 : index
    %c3 = arith.constant 3 : index
    %c0_21 = arith.constant 0 : index
    %c0_22 = arith.constant 0 : index
    %24 = vector.load %arg6[%c0_20, %c3, %c0_21, %c0_22] : memref<1x4x16x8xf32, #tpu.memory_space<vmem>>, vector<1x1x16x8xf32>
    %25 = vector.shape_cast %24 : vector<1x1x16x8xf32> to vector<16x8xf32>
    %26 = vector.shape_cast %14 : vector<16x8xf32> to vector<1x1x16x8xf32>
    tpu.vector_store %arg6[%c0_20, %c3, %c0_21, %c0_22], %26 {strides = array<i32>} : memref<1x4x16x8xf32, #tpu.memory_space<vmem>>, vector<1x1x16x8xf32>,
    return
  }
  func.func @transform_0(%arg0: i32, %arg1: i32) -> i32 {
    %c0_i32 = arith.constant 0 : i32
    %c0_i32_0 = arith.constant 0 : i32
    return %c0_i32 : i32
  }
  func.func @transform_1(%arg0: i32, %arg1: i32) -> (i32, i32, i32) {
    %c0_i32 = arith.constant 0 : i32
    %c0_i32_0 = arith.constant 0 : i32
    return %arg0, %arg1, %c0_i32 : i32, i32, i32
  }
  func.func @transform_2(%arg0: i32, %arg1: i32) -> (i32, i32) {
    %c0_i32 = arith.constant 0 : i32
    %c0_i32_0 = arith.constant 0 : i32
    %c0_i32_1 = arith.constant 0 : i32
    return %c0_i32, %c0_i32_0 : i32, i32
  }
  func.func @transform_3(%arg0: i32, %arg1: i32) -> (i32, i32) {
    %c0_i32 = arith.constant 0 : i32
    %c0_i32_0 = arith.constant 0 : i32
    %c0_i32_1 = arith.constant 0 : i32
    return %c0_i32, %c0_i32_0 : i32, i32
  }
  func.func @transform_4(%arg0: i32, %arg1: i32) -> (i32, i32, i32, i32) {
    %c0_i32 = arith.constant 0 : i32
    %c0_i32_0 = arith.constant 0 : i32
    %c0_i32_1 = arith.constant 0 : i32
    return %arg0, %c0_i32, %arg1, %c0_i32_0 : i32, i32, i32, i32
  }
}

</mosaic_0001>

<bundles_post_ra>
// kernel: tpu_custom_call.1
= control target key start
LH: loop header
LB: loop body
LE: loop exit
PB: predicated region body
PF: predicated region fallthrough
CT: control target
= control target key end

     0   :  { %s3336_s0 = inlined_call_operand.<no memory space> [shape: f32[1], index: 0, kind: input, shape index: {}]   ;;  %s3337_s1 = inlined_call_operand.hbm [shape: f32[2,32,32], index: 1, kind: input, shape index: {}]   ;;  %s3338_s2 = inlined_call_operand.vmem [shape: f32[16,8], index: 2, kind: input, shape index: {}]   ;;  %s3339_s3 = inlined_call_operand.vmem [shape: f32[16,8], index: 3, kind: input, shape index: {}]   ;;  %s3340_s4 = inlined_call_operand.vmem [shape: f32[2,4,32,8], index: 4, kind: output, shape index: {}]  }
   0x1   :  { %9 = sst [smem:[#allocation2]] %s3336_s0 }
   0x2   :  { %10 = vsyncpa [#allocation4], 0 }
   0x3   :  { %12 = vsyncpa [#allocation4 + $0x1], 0  ;;  %s3078_s17 = smov 0   ;;  %s3080_s18 = smov 0  }
   0x4   :  { %s3082_s19 = smov 0   ;;  %s3084_s20 = smov 0  }
   0x5   :  { %s3086_s21 = smov 0   ;;  %s3088_s22 = smov 0  }
   0x6   :  { %s3090_s23 = smov 0   ;;  %s3092_s24 = smov 0  }
   0x7 LB: > { %s2447_s0 = sadd.s32 4294967295, %s3043_s24   ;;  %s27_s25 = sadd.s32 1, %s3035_s22  ;;  %s3043_s24 = sphi %s3092_s24, %s18_s24   ;;  %s3039_s23 = sphi %s3090_s23, %s3353_s23   ;;  %s3035_s22 = sphi %s3088_s22, %s3352_s22   ;;  %s3031_s21 = sphi %s3086_s21, %s3351_s21   ;;  %s3027_s20 = sphi %s3084_s20, %s3350_s20   ;;  %s3023_s19 = sphi %s3082_s19, %s3349_s19   ;;  %s3019_s18 = sphi %s3080_s18, %s3348_s18   ;;  %s3015_s17 = sphi %s3078_s17, %s3347_s17  }
   0x8   : > { %p28_p0 = scmp.ge.s32.totalorder %s27_s25, 2  ;;  %s30_s26 = sadd.s32 1, %s3039_s23 }
   0x9   : > { %s60_s27 = sadd.s32 1, %s3023_s19  ;;  %p67_p1 = scmp.ne.s32.totalorder %s3023_s19, %s3019_s18 }
   0xa   : > { %s3355_s25 = smov (%p28_p0, %s27_s25), 0  ;;  %s3357_s26 = smov (!%p28_p0, %s30_s26), %s3039_s23 }
   0xb   : > { %s56_s28 = ssub.s32 %s3035_s22, %s3355_s25  ;;  %p68_p2 = scmp.eq.s32.totalorder %s3043_s24, 0 }
   0xc   : > { %p32_p3 = scmp.ge.s32.totalorder %s3357_s26, 2  ;;  %p73_p4 = scmp.ne.s32.totalorder %s3019_s18, %s3015_s17 }
   0xd   : > { %p3132_p5 = por %p68_p2, %p67_p1  ;;  %p74_p6 = scmp.eq.s32.totalorder %s2447_s0, 0 }
   0xe   : > { %s3359_s26 = smov (%p32_p3, %s3357_s26), 0  ;;  %p141_p8 = scmp.eq.s32.totalorder %s2447_s0, 3 }
   0xf   : > { %p3138_p7 = por %p74_p6, %p73_p4  ;;  %s55_s5 = ssub.s32 %s3039_s23, %s3359_s26 }
  0x10   : > { %s57_s6 = sor.u32 %s56_s28, %s55_s5  ;;  %p3147_p9 = por %p141_p8, %p67_p1 }
  0x11   : > { %p58_p10 = scmp.eq.s32.totalorder %s57_s6, 0  ;;  %p2878_p11 = scmp.lt.s32.totalorder %s3043_s24, 4 }
  0x12   : > { %s3343_s7 = scalar_select %p3147_p9, 1, 0 }
  0x13   : > { %s176_s8 = sand.u32 1, %s3023_s19   ;;  %s2452_s9 = sshll.u32 %s3035_s22, 1 }
  0x14   : > { %s3155_s10 = scalar_select %p58_p10, %s3023_s19, %s60_s27  }
  0x15   : > { %s2451_s11 = sshll.u32 %s176_s8, 4  ;;  %s2453_s12 = sshll.u32 %s3039_s23, 2 }
  0x16   : > { %s186_s13 = sadd.s32 %s2453_s12, %s2452_s9  ;;  %s180_s14 = scalar_lea.vmem [#allocation3], %s2451_s11 }
  0x17   : > { %s189_s15 = sshll.u32 %s180_s14, 4  ;;  %s2454_s16 = sshll.u32 %s186_s13, 7  ;;  %s3158_s15 = int_to_ptr.vmem [resolvable:$true] %s189_s15 }
  0x18   : > { %s3163_s28 = scalar_lea.hbm %s3337_s1, %s2454_s16  ;;  %p3167_p12 = pnand %p2878_p11, %p3132_p5 }
  0x19   : > { %s3172_s5 = scalar_lea.sflag [#allocation4], %s176_s8  ;;  %s2947_s6 = scalar_lea.hbm %s3163_s28, 256 }
  0x1a   : > { %p2948_p0 = scmp.ne.s32.totalorder %s3163_s28, %s2947_s6  ;;  %p2949_p1 = pneg %p3167_p12 }
  0x1b   : > { %s2952_s11 = scalar_lea.hbm %s3337_s1, 1024  ;;  %p2953_p4 = scmp.lt.u32.totalorder %s3163_s28, %s3337_s1 }
  0x1c   : > { %p2950_p2 = pnand %p2949_p1, %p2948_p0  ;;  %p2954_p5 = scmp.lt.u32.totalorder %s2952_s11, %s2947_s6 }
  0x1d   : > { %p2956_p8 = scmp.lt.u32.totalorder %s2947_s6, %s3163_s28 }
  0x1e   : > { %p2951_p3 = pneg %p2950_p2  ;;  %p2955_p6 = por %p2954_p5, %p2953_p4 }
  0x20   : > { %p2957_p10 = por %p2956_p8, %p2955_p6 }
  0x22   : > { %p2958_p11 = pnand %p2957_p10, %p2951_p3 }
  0x24   : > { %2961 = shalt.err (!%p2958_p11)
}
  0x25   : > { %s2962_s8 = scalar_lea.vmem %s3158_s15, 256  ;;  %s3045_s14 = smov [#allocation3]  }
  0x26   : > { %p2963_p0 = scmp.ne.s32.totalorder %s3158_s15, %s2962_s8  ;;  %s2967_s16 = sshll.u32 %s3045_s14, 4  ;;  %s2968_s16 = int_to_ptr.vmem [resolvable:$false] %s2967_s16 }
  0x27   : > { %s2969_s17 = scalar_lea.vmem %s2968_s16, 512  ;;  %p2970_p9 = scmp.lt.s32.totalorder %s3158_s15, %s2968_s16 }
  0x28   : > { %p2965_p2 = pnand %p2963_p0, %p2949_p1  ;;  %p2971_p4 = scmp.lt.s32.totalorder %s2969_s17, %s2962_s8 }
  0x2a   : > { %p2966_p13 = pneg %p2965_p2  ;;  %p2972_p5 = por %p2971_p4, %p2970_p9 }
  0x2c   : > { %p2973_p6 = pnand %p2972_p5, %p2966_p13 }
  0x2e   : > { %2976 = shalt.err (!%p2973_p6)
}
  0x2f   : > { %s3046_s0 = smov 128   ;;  %s3047_s6 = smov 8  }
  0x30   : > { %2877 = dma.hbm_to_vmem [thread:$0]  (!%p3167_p12), %s3163_s28, 256, %s3158_s15, %s3172_s5, %s3046_s0, %s3046_s0, %s3047_s6  }
  0x31   : > { %p197_p1 = scmp.lt.s32.totalorder %s3043_s24, 5  ;;  %p3345_p3 = scmp.ge.s32.totalorder %s3043_s24, 1 }
  0x33   : > { %p198_p8 = pnand %p3345_p3, %p197_p1 }
  0x34   : > { %s3204_s29 = sand.u32 (!%p198_p8), 1, %s3019_s18  }
  0x35   : > { %201 = sbr.rel (%p198_p8) target bundleno = 571 (0x23b), region = 36  ;;  %s2456_s9 = sshll.u32 (!%p198_p8), %s3204_s29, 4 }
  0x36   : > { %s204_s11 = scalar_lea.sflag (!%p198_p8), [#allocation4], %s3204_s29  ;;  %s207_s12 = scalar_lea.vmem (!%p198_p8), [#allocation3], %s2456_s9 }
  0x3c   : > { %3010 = dma.done.wait (%p3138_p7), %s204_s11, 256  }
  0x3d   : > { %3012 = vsyncadd (%p3138_p7), %s204_s11, 4294967040  ;;  %v233_v0 = vld [vmem:[%s207_s12] sm:$0xff]  ;;  %s3048_s27 = smov 16   ;;  %s3049_s5 = smov 112   ;;  %v254_v2 = vld [vmem:[%s3338_s2 + $0x8] sm:$0xff]  ;;  %vm259_vm0 = vcmask 130048  }
  0x3e   : > { %v253_v1 = vld [vmem:[%s3338_s2] sm:$0xff]  ;;  %245 = vrot.lane.b32.xlu0 %v233_v0, %s3048_s27  ;;  %237 = vrot.lane.b32.xlu1 %v233_v0, %s3049_s5  ;;  %v234_v5 = vld [vmem:[%s207_s12 + $0x8] sm:$0xff]  ;;  %v270_v6 = vand.u32 4294901760, %v254_v2  ;;  %s257_s0 = sld [smem:[#allocation2]]  ;;  %s2457_s6 = sshll.u32 %s3204_s29, 6  ;;  %vm2284_vm1 = vcmask 64512  }
  0x3f   : > { %v267_v3 = vand.u32 4294901760, %v253_v1  ;;  %v255_v4 = vld [vmem:[%s3339_s3] sm:$0xff]  ;;  %v256_v7 = vld [vmem:[%s3339_s3 + $0x8] sm:$0xff]  ;;  %s230_s9 = scalar_lea.vmem [#allocation5], %s2457_s6  ;;  %p3346_p7 = scmp.ne.s32.totalorder %s3343_s7, 0 }
  0x40   : > { %v769_v8 = vand.u32 4294901760, %v255_v4  ;;  %v772_v9 = vand.u32 4294901760, %v256_v7  ;;  %v362_v13 = vsub.f32 %v254_v2, %v270_v6  ;;  %s2465_s29 = sshll.u32 (%p3346_p7), %s3027_s20, 1  ;;  %s2466_s11 = sshll.u32 (%p3346_p7), %s3031_s21, 4 }
  0x41   : > { %v3225_v10 = vpack.c.bf16 %v270_v6, %v267_v3  ;;  %v355_v12 = vsub.f32 %v253_v1, %v267_v3  ;;  %s2305_s12 = sadd.s32 (%p3346_p7), %s2466_s11, %s2465_s29 }
  0x42   : > { %247 = vrot.lane.b32.xlu0 %v234_v5, %s3048_s27  ;;  %239 = vrot.lane.b32.xlu1 %v234_v5, %s3049_s5  ;;  %v3228_v11 = vpack.c.bf16 %v772_v9, %v769_v8  ;;  %v857_v14 = vsub.f32 %v255_v4, %v769_v8  ;;  %v864_v15 = vsub.f32 %v256_v7, %v772_v9  ;;  %v363_v17 = vand.u32 4294901760, %v362_v13  ;;  %s2467_s15 = sshll.u32 (%p3346_p7), %s2305_s12, 3 }
  0x43   : > { %2735 = vmatprep.subr.bf16.mxu0 %v3225_v10  ;;  %v356_v16 = vand.u32 4294901760, %v355_v12  ;;  %v3236_v29 = vpack.c.bf16 %v362_v13, %v355_v12 }
  0x44   : > { %2759 = vmatprep.subr.bf16.mxu1 %v3228_v11  ;;  %2737 = vmatpush3.bf16.msra.mxu0 %v3225_v10  ;;  %v858_v18 = vand.u32 4294901760, %v857_v14  ;;  %v865_v19 = vand.u32 4294901760, %v864_v15  ;;  %v364_v21 = vsub.f32 %v362_v13, %v363_v17  ;;  %v3238_v30 = vpack.c.bf16 %v864_v15, %v857_v14 }
  0x45   : > { %2761 = vmatpush3.bf16.msra.mxu1 %v3228_v11  ;;  %v357_v20 = vsub.f32 %v355_v12, %v356_v16  ;;  %v3244_v32 = vpack.c.bf16 %v363_v17, %v356_v16  ;;  %v258_v4 = vstv %s257_s0 }
  0x46   : > { %v859_v22 = vsub.f32 %v857_v14, %v858_v18  ;;  %v866_v23 = vsub.f32 %v864_v15, %v865_v19  ;;  %v365_v25 = vand.u32 4294901760, %v364_v21  ;;  %v3246_v33 = vpack.c.bf16 %v865_v19, %v858_v18 }
  0x47   : > { %v358_v24 = vand.u32 4294901760, %v357_v20 }
  0x48   : > { %v860_v26 = vand.u32 4294901760, %v859_v22  ;;  %v867_v27 = vand.u32 4294901760, %v866_v23 }
  0x49   : > { %v3234_v28 = vpack.c.bf16 %v365_v25, %v358_v24 }
  0x4a   : > { %v3240_v31 = vpack.c.bf16 %v867_v27, %v860_v26 }
  0x4b   : > { %2739 = vmatprep.subr.bf16.mxu0 %v3234_v28 }
  0x4c   : > { %2763 = vmatprep.subr.bf16.mxu1 %v3240_v31 }
  0xb0   : > { %v246_v34 = vpop.permute.xlu0 %245  ;;  %v238_v35 = vpop.permute.xlu1 %237 }
  0xb1   : > { %v251_v36 = vsub.f32 %v233_v0, %v246_v34  ;;  %v243_v37 = vadd.f32 %v238_v35, %v233_v0 }
  0xb3   : > { %1272 = vrot.lane.b32.xlu0 %v251_v36, %s3049_s5  ;;  %v261_v38 = vsel %vm259_vm0, %v243_v37, 0 }
  0xb4   : > { %v248_v39 = vpop.permute.xlu0 %247  ;;  %v333_v40 = vand.u32 4294901760, %v261_v38  ;;  %v240_v41 = vpop.permute.xlu1 %239 }
  0xb5   : > { %v252_v42 = vsub.f32 %v234_v5, %v248_v39  ;;  %v244_v43 = vadd.f32 %v240_v41, %v234_v5 }
  0xb6   : > { %v334_v44 = vsub.f32 %v261_v38, %v333_v40 }
  0xb7   : > { %1274 = vrot.lane.b32.xlu1 %v252_v42, %s3049_s5  ;;  %v264_v45 = vsel %vm259_vm0, %v244_v43, 0  ;;  %s2307_s5 = scalar_lea.vmem (%p3346_p7), %s3340_s4, %s2467_s15 }
  0xb8   : > { %v343_v46 = vand.u32 4294901760, %v264_v45  ;;  %v335_v47 = vand.u32 4294901760, %v334_v44 }
  0xba   : > { %v344_v48 = vsub.f32 %v264_v45, %v343_v46  ;;  %v336_v49 = vsub.f32 %v334_v44, %v335_v47 }
  0xbc   : > { %v337_v50 = vand.u32 4294901760, %v336_v49  ;;  %v345_v51 = vand.u32 4294901760, %v344_v48 }
  0xbe   : > { %2570 = vmatprep.mubr.f32.mxu0 %v337_v50  ;;  %2612 = vmatprep.mubr.f32.mxu1 %v337_v50  ;;  %v346_v52 = vsub.f32 %v344_v48, %v345_v51 }
  0xc0   : > { %v347_v53 = vand.u32 4294901760, %v346_v52 }
  0xc2   : > { %2571 = vmatmul.mubr.f32.vlgmr.msra.gmra.mrb[0].mxu0 %v347_v53  ;;  %2613 = vmatmul.mubr.f32.vlgmr.msra.gmra.mrb[0].mxu1 %v347_v53 }
  0xc3   : > { %2741 = vmatpush3.bf16.msra.mxu0 %v3234_v28  ;;  %2765 = vmatpush3.bf16.msra.mxu1 %v3240_v31 }
  0xc4   : > { %2577 = vmatprep.mubr.f32.mxu0 %v333_v40  ;;  %2619 = vmatprep.mubr.f32.mxu1 %v333_v40 }
  0xc5   : > { %2743 = vmatprep.subr.bf16.mxu0 %v3236_v29  ;;  %2767 = vmatprep.subr.bf16.mxu1 %v3238_v30 }
  0xca   : > { %2578 = vmatmul.mubr.f32.vlgmr.msra.gmra.mrb[0].mxu0 %v343_v46  ;;  %2620 = vmatmul.mubr.f32.vlgmr.msra.gmra.mrb[0].mxu1 %v343_v46 }
  0xcb   : > { %2745 = vmatpush3.bf16.msra.mxu0 %v3236_v29  ;;  %2769 = vmatpush3.bf16.msra.mxu1 %v3238_v30 }
  0xcc   : > { %2584 = vmatprep.mubr.f32.mxu0 %v334_v44  ;;  %2626 = vmatprep.mubr.f32.mxu1 %v334_v44 }
  0xcd   : > { %2747 = vmatprep.subr.bf16.mxu0 %v3225_v10  ;;  %2771 = vmatprep.subr.bf16.mxu1 %v3228_v11 }
  0xd2   : > { %2585 = vmatmul.mubr.f32.vlgmr.msra.gmra.mrb[0].mxu0 %v344_v48  ;;  %2627 = vmatmul.mubr.f32.vlgmr.msra.gmra.mrb[0].mxu1 %v344_v48 }
  0xd3   : > { %2749 = vmatpush3.bf16.msra.mxu0 %v3225_v10  ;;  %2773 = vmatpush3.bf16.msra.mxu1 %v3228_v11 }
  0xd4   : > { %2591 = vmatprep.mubr.f32.mxu0 %v335_v47  ;;  %2633 = vmatprep.mubr.f32.mxu1 %v335_v47 }
  0xd5   : > { %2751 = vmatprep.subr.bf16.mxu0 %v3244_v32  ;;  %2775 = vmatprep.subr.bf16.mxu1 %v3246_v33 }
  0xda   : > { %2592 = vmatmul.mubr.f32.vlgmr.msra.gmra.mrb[0].mxu0 %v345_v51  ;;  %2634 = vmatmul.mubr.f32.vlgmr.msra.gmra.mrb[0].mxu1 %v345_v51 }
  0xdb   : > { %2753 = vmatpush3.bf16.msra.mxu0 %v3244_v32  ;;  %2777 = vmatpush3.bf16.msra.mxu1 %v3246_v33 }
  0xdc   : > { %2598 = vmatprep.mubr.f32.mxu0 %v333_v40  ;;  %2640 = vmatprep.mubr.f32.mxu1 %v333_v40 }
  0xdd   : > { %2755 = vmatprep.subr.bf16.mxu0 %v3225_v10  ;;  %2779 = vmatprep.subr.bf16.mxu1 %v3228_v11 }
  0xe2   : > { %2599 = vmatmul.mubr.f32.vlgmr.msra.gmra.mrb[0].mxu0 %v343_v46  ;;  %2641 = vmatmul.mubr.f32.vlgmr.msra.gmra.mrb[0].mxu1 %v343_v46 }
  0xe3   : > { %2757 = vmatpush3.bf16.msra.mxu0 %v3225_v10  ;;  %2605 = vmatprep.mubr.f32.mxu0 %v333_v40 }
  0xe4   : > { %2781 = vmatpush3.bf16.msra.mxu1 %v3228_v11  ;;  %2647 = vmatprep.mubr.f32.mxu1 %v333_v40 }
  0xe5   : > { %2783 = vmatprep.subr.bf16.mxu0 %v3225_v10  ;;  %2807 = vmatprep.subr.bf16.mxu1 %v3228_v11 }
  0xea   : > { %2606 = vmatmul.mubr.f32.vlgmr.msra.gmra.mrb[0].mxu0 %v343_v46  ;;  %2648 = vmatmul.mubr.f32.vlgmr.msra.gmra.mrb[0].mxu1 %v343_v46 }
  0xeb   : > { %2785 = vmatpush3.bf16.msra.mxu0 %v3225_v10  ;;  %2809 = vmatpush3.bf16.msra.mxu1 %v3228_v11 }
  0xec   : > { %2787 = vmatprep.subr.bf16.mxu0 %v3234_v28  ;;  %2811 = vmatprep.subr.bf16.mxu1 %v3240_v31 }
 0x125   : > { %v1273_v54 = vpop.permute.xlu0 %1272 }
 0x126   : > { %v1276_v55 = vsel %vm259_vm0, %v1273_v54, 0 }
 0x127   : > { %v1347_v56 = vand.u32 4294901760, %v1276_v55 }
 0x129   : > { %v1348_v57 = vsub.f32 %v1276_v55, %v1347_v56  ;;  %v1275_v58 = vpop.permute.xlu1 %1274 }
 0x12a   : > { %v1278_v59 = vsel %vm259_vm0, %v1275_v58, 0 }
 0x12b   : > { %v1357_v60 = vand.u32 4294901760, %v1278_v59  ;;  %v1349_v61 = vand.u32 4294901760, %v1348_v57 }
 0x12d   : > { %v1358_v62 = vsub.f32 %v1278_v59, %v1357_v60  ;;  %v1350_v63 = vsub.f32 %v1348_v57, %v1349_v61 }
 0x12f   : > { %v1359_v0 = vand.u32 4294901760, %v1358_v62  ;;  %v1351_v1 = vand.u32 4294901760, %v1350_v63 }
 0x131   : > { %2654 = vmatprep.mubr.f32.mxu0 %v1351_v1  ;;  %2696 = vmatprep.mubr.f32.mxu1 %v1351_v1  ;;  %v1360_v2 = vsub.f32 %v1358_v62, %v1359_v0 }
 0x133   : > { %v1361_v3 = vand.u32 4294901760, %v1360_v2 }
 0x135   : > { %2655 = vmatmul.mubr.f32.vlgmr.msra.gmra.mrb[2].mxu0 %v1361_v3  ;;  %2697 = vmatmul.mubr.f32.vlgmr.msra.gmra.mrb[2].mxu1 %v1361_v3 }
 0x136   : > { %2789 = vmatpush3.bf16.msra.mxu0 %v3234_v28  ;;  %2813 = vmatpush3.bf16.msra.mxu1 %v3240_v31 }
 0x137   : > { %2661 = vmatprep.mubr.f32.mxu0 %v1347_v56  ;;  %2703 = vmatprep.mubr.f32.mxu1 %v1347_v56 }
 0x138   : > { %2791 = vmatprep.subr.bf16.mxu0 %v3236_v29  ;;  %2815 = vmatprep.subr.bf16.mxu1 %v3238_v30 }
 0x13d   : > { %2662 = vmatmul.mubr.f32.vlgmr.msra.gmra.mrb[2].mxu0 %v1357_v60  ;;  %2704 = vmatmul.mubr.f32.vlgmr.msra.gmra.mrb[2].mxu1 %v1357_v60 }
 0x13e   : > { %2793 = vmatpush3.bf16.msra.mxu0 %v3236_v29  ;;  %2817 = vmatpush3.bf16.msra.mxu1 %v3238_v30 }
 0x13f   : > { %2668 = vmatprep.mubr.f32.mxu0 %v1348_v57  ;;  %2710 = vmatprep.mubr.f32.mxu1 %v1348_v57 }
 0x140   : > { %2795 = vmatprep.subr.bf16.mxu0 %v3225_v10  ;;  %2819 = vmatprep.subr.bf16.mxu1 %v3228_v11 }
 0x145   : > { %2669 = vmatmul.mubr.f32.vlgmr.msra.gmra.mrb[2].mxu0 %v1358_v62  ;;  %2711 = vmatmul.mubr.f32.vlgmr.msra.gmra.mrb[2].mxu1 %v1358_v62 }
 0x146   : > { %2797 = vmatpush3.bf16.msra.mxu0 %v3225_v10  ;;  %2821 = vmatpush3.bf16.msra.mxu1 %v3228_v11 }
 0x147   : > { %2675 = vmatprep.mubr.f32.mxu0 %v1349_v61  ;;  %2717 = vmatprep.mubr.f32.mxu1 %v1349_v61 }
 0x148   : > { %2799 = vmatprep.subr.bf16.mxu0 %v3244_v32  ;;  %2823 = vmatprep.subr.bf16.mxu1 %v3246_v33 }
 0x14d   : > { %2676 = vmatmul.mubr.f32.vlgmr.msra.gmra.mrb[2].mxu0 %v1359_v0  ;;  %2718 = vmatmul.mubr.f32.vlgmr.msra.gmra.mrb[2].mxu1 %v1359_v0 }
 0x14e   : > { %2801 = vmatpush3.bf16.msra.mxu0 %v3244_v32  ;;  %2825 = vmatpush3.bf16.msra.mxu1 %v3246_v33 }
 0x14f   : > { %2682 = vmatprep.mubr.f32.mxu0 %v1347_v56  ;;  %2724 = vmatprep.mubr.f32.mxu1 %v1347_v56 }
 0x150   : > { %2803 = vmatprep.subr.bf16.mxu0 %v3225_v10  ;;  %2827 = vmatprep.subr.bf16.mxu1 %v3228_v11 }
 0x155   : > { %2683 = vmatmul.mubr.f32.vlgmr.msra.gmra.mrb[2].mxu0 %v1357_v60  ;;  %2725 = vmatmul.mubr.f32.vlgmr.msra.gmra.mrb[2].mxu1 %v1357_v60 }
 0x156   : > { %2805 = vmatpush3.bf16.msra.mxu0 %v3225_v10  ;;  %2829 = vmatpush3.bf16.msra.mxu1 %v3228_v11 }
 0x157   : > { %2689 = vmatprep.mubr.f32.mxu0 %v1347_v56  ;;  %2731 = vmatprep.mubr.f32.mxu1 %v1347_v56 }
 0x15d   : > { %2690 = vmatmul.mubr.f32.vlgmr.msra.gmra.mrb[2].mxu0 %v1357_v60  ;;  %2732 = vmatmul.mubr.f32.vlgmr.msra.gmra.mrb[2].mxu1 %v1357_v60 }
 0x1bd   : > { %v2607_v5 = vpop.f32.mrb[0].mxu0  ;;  %v2649_v6 = vpop.f32.mrb[0].mxu1 }
 0x1be   : > { %v2830_v7 = vadd.f32 %v2607_v5, %v258_v4  ;;  %2459 = vst.msk [vmem:[%s230_s9 + $0x18] sm:$0xff] %vm2284_vm1, %v2649_v6  ;;  %v758_v8 = vpop.f32.mrb[1].mxu0  ;;  %v1260_v9 = vpop.f32.mrb[1].mxu1 }
 0x1bf   : > { %v2831_v12 = vadd.f32 %v758_v8, %v258_v4  ;;  %2458 = vst.msk [vmem:[%s230_s9 + $0x10] sm:$0xff] %vm2284_vm1, %v1260_v9 }
 0x1c0   : > { %2286 = vst.msk [vmem:[%s230_s9 + $0x8] sm:$0xff] %vm2284_vm1, %v2830_v7 }
 0x1c1   : > { %2285 = vst.msk [vmem:[%s230_s9] sm:$0xff] %vm2284_vm1, %v2831_v12 }
 0x1c5   : > { %v2355_v18 = vld [vmem:[%s230_s9 + $0x18] sm:$0xff] (%p3346_p7) }
 0x1c6   : > { %v2353_v17 = vld [vmem:[%s230_s9 + $0x10] sm:$0xff] (%p3346_p7)  ;;  %2356 = vst [vmem:[%s2307_s5 + $0x28] sm:$0xff] (%p3346_p7), %v2355_v18 }
 0x1c7   : > { %v2351_v16 = vld [vmem:[%s230_s9 + $0x8] sm:$0xff] (%p3346_p7)  ;;  %2354 = vst [vmem:[%s2307_s5 + $0x20] sm:$0xff] (%p3346_p7), %v2353_v17 }
 0x1c8   : > { %v2349_v15 = vld [vmem:[%s230_s9] sm:$0xff] (%p3346_p7)  ;;  %2352 = vst [vmem:[%s2307_s5 + $0x8] sm:$0xff] (%p3346_p7), %v2351_v16 }
 0x1c9   : > { %2350 = vst [vmem:[%s2307_s5] sm:$0xff] (%p3346_p7), %v2349_v15 }
 0x22c   : > { %2302 = sbr.rel (!%p3346_p7) target bundleno = 571 (0x23b), region = 44 }
 0x230   : > { %v2691_v10 = vpop.f32.mrb[2].mxu0  ;;  %v2733_v11 = vpop.f32.mrb[2].mxu1 }
 0x231   : > { %2461 = vst.msk [vmem:[%s230_s9 + $0x28] sm:$0xff] %vm2284_vm1, %v2691_v10  ;;  %2463 = vst.msk [vmem:[%s230_s9 + $0x38] sm:$0xff] %vm2284_vm1, %v2733_v11  ;;  %v1772_v13 = vpop.f32.mrb[3].mxu0  ;;  %v2274_v14 = vpop.f32.mrb[3].mxu1 }
 0x232   : > { %2460 = vst.msk [vmem:[%s230_s9 + $0x20] sm:$0xff] %vm2284_vm1, %v1772_v13  ;;  %2462 = vst.msk [vmem:[%s230_s9 + $0x30] sm:$0xff] %vm2284_vm1, %v2274_v14 }
 0x238   : > { %v2359_v20 = vld [vmem:[%s230_s9 + $0x28] sm:$0xff]  ;;  %v2363_v22 = vld [vmem:[%s230_s9 + $0x38] sm:$0xff] }
 0x239   : > { %v2357_v19 = vld [vmem:[%s230_s9 + $0x20] sm:$0xff]  ;;  %v2361_v21 = vld [vmem:[%s230_s9 + $0x30] sm:$0xff]  ;;  %2360 = vst [vmem:[%s2307_s5 + $0x48] sm:$0xff] %v2359_v20  ;;  %2364 = vst [vmem:[%s2307_s5 + $0x68] sm:$0xff] %v2363_v22 }
 0x23a   : > { %2358 = vst [vmem:[%s2307_s5 + $0x40] sm:$0xff] %v2357_v19  ;;  %2362 = vst [vmem:[%s2307_s5 + $0x60] sm:$0xff] %v2361_v21 }
 0x23b PF: > { %s18_s24 = sadd.s32 1, %s3043_s24   ;;  %s3347_s17 = smov %s3019_s18 }
 0x23c   : > { %p15_p9 = scmp.ge.s32.totalorder %s18_s24, 6   ;;  %s3348_s18 = smov %s3023_s19 }
 0x23d   : > { %s3349_s19 = smov %s3155_s10  ;;  %s3350_s20 = smov %s3035_s22 }
 0x23e   : > { %s3351_s21 = smov %s3039_s23  ;;  %s3352_s22 = smov %s3355_s25 }
 0x23f   : > { %s3353_s23 = smov %s3359_s26  ;;  %17 = sbr.rel (!%p15_p9) target bundleno = 7 (0x7), region = 117 }
 0x246   :  { %2380 = vsyncpa [#allocation4], 1 }
 0x247   :  { %2382 = vsyncpa [#allocation4 + $0x1], 1 }

</bundles_post_ra>
